<compile_context>
chip_gen: v7x
topology: tpu7x:2x2x1
jax: 0.10.0
libtpu: 0.0.40
codegen_flags: <defaults>
</compile_context>

<pallas_src>
import functools

import jax
import jax.numpy as jnp
from jax.experimental import pallas as pl
from jax.experimental.pallas import tpu as pltpu


# ---------------------------------------------------------------------------
# Helpers
# ---------------------------------------------------------------------------

def _round_up(x, m):
    return (x + m - 1) // m * m


def _vmem_capacity_bytes():
    """Best-effort per-TensorCore VMEM capacity; conservative fallback."""
    try:
        kind = jax.devices()[0].device_kind.lower()
    except Exception:
        kind = ""
    if "v7" in kind:
        return 64 * 1024 * 1024
    if any(t in kind for t in ("v5e", "v5 lite", "v5litepod", "v6", "v6e")):
        return 128 * 1024 * 1024
    return 64 * 1024 * 1024  # unknown chip: stay conservative


def _choose_tiles(M, K, n_pad, x_isz, w_isz, out_isz, budget_bytes):
    """Pick (tm, tn, tk) so the double-buffered X/W/bias/out tiles (+ f32 accumulator
    when K is tiled) fit within `budget_bytes`.  Preference order:
      full-K & full-N (W loaded exactly once)  >  full-K, tiled N  >  tiled K, full N
      >  tiled K & N;  within a combo take the largest row tile that fits."""
    cap_m = M if M <= 8 else _round_up(M, 8)
    if M <= 8:
        tm_opts = [M]
    else:
        tm_opts = sorted({min(c, cap_m) for c in (2048, 1024, 512, 256, 128, 64, 32, 16, 8)},
                         reverse=True)

    def footprint(tm, tn, tk, k_tiled):
        b = 2 * tm * tk * x_isz        # X tiles (double-buffered)
        b += 2 * tk * tn * w_isz       # W tiles
        b += 2 * tn * w_isz            # bias tiles
        b += 2 * tm * tn * out_isz     # out tiles
        if k_tiled:
            b += tm * tn * 4           # f32 accumulator scratch
        return b

    # tn: full n_pad first, then lane-dense / MXU-wide 256-multiples.
    tn_cands = [n_pad] + [c for c in (2048, 1024, 512, 256, 128) if c < n_pad]
    # tk: full K first, then 256-multiples that divide K exactly (no ragged K blocks).
    tk_cands = [K] + [c for c in (4096, 2048, 1024, 512, 256) if c < K and K % c == 0]

    min_tm_ok = min(256, cap_m)
    best = None
    for tk in tk_cands:
        for tn in tn_cands:
            k_tiled = tk != K
            tm_fit = None
            for tm in tm_opts:
                if footprint(tm, tn, tk, k_tiled) <= budget_bytes:
                    tm_fit = tm
                    break
            if tm_fit is None:
                continue
            if best is None or tm_fit > best[0]:
                best = (tm_fit, tn, tk)
            if tm_fit >= min_tm_ok:
                return tm_fit, tn, tk
    if best is not None:
        return best
    # Nothing fits the budget even at minimal tiles; the raised vmem_limit absorbs it.
    return tm_opts[-1], tn_cands[-1], tk_cands[-1]


# ---------------------------------------------------------------------------
# Kernels
# ---------------------------------------------------------------------------

def _proj_kernel(x_ref, w_ref, b_ref, o_ref, *, compute_dtype):
    """o = x @ w + b with K fully resident (one MXU matmul per tile)."""
    xv = x_ref[...]
    wv = w_ref[...]
    if compute_dtype is not None:
        xv = xv.astype(compute_dtype)
        wv = wv.astype(compute_dtype)
    acc = jnp.dot(xv, wv, preferred_element_type=jnp.float32)
    o_ref[...] = (acc + b_ref[...].astype(jnp.float32)).astype(o_ref.dtype)


def _proj_kernel_ktiled(x_ref, w_ref, b_ref, o_ref, acc_ref, *, compute_dtype):
    """K-tiled o = x @ w + b with an f32 VMEM accumulator (grid axis 2 = reduction)."""
    k = pl.program_id(2)

    @pl.when(k == 0)
    def _():
        acc_ref[...] = jnp.zeros_like(acc_ref)

    xv = x_ref[...]
    wv = w_ref[...]
    if compute_dtype is not None:
        xv = xv.astype(compute_dtype)
        wv = wv.astype(compute_dtype)
    acc_ref[...] += jnp.dot(xv, wv, preferred_element_type=jnp.float32)

    @pl.when(k == pl.num_programs(2) - 1)
    def _():
        o_ref[...] = (acc_ref[...] + b_ref[...].astype(jnp.float32)).astype(o_ref.dtype)


# ---------------------------------------------------------------------------
# Parameter prep (runs ONCE, outside the jitted forward)
# ---------------------------------------------------------------------------

def pad_params(weight, bias, dtype=None):
    """Pad the N axis of (in_dim, out_dim) weight and (out_dim,) bias once to a
    multiple of 128 (lane-dense, unmasked kernel stores).  Optionally cast (e.g. to
    bfloat16 to feed the MXU natively and halve W HBM traffic)."""
    in_dim, out_dim = weight.shape
    n_pad = _round_up(out_dim, 128)
    if dtype is not None:
        weight = weight.astype(dtype)
        bias = bias.astype(dtype)
    if n_pad != out_dim:
        weight = jnp.pad(weight, ((0, 0), (0, n_pad - out_dim)))
        bias = jnp.pad(bias, (0, n_pad - out_dim))
    return weight, bias.reshape(1, n_pad)


# ---------------------------------------------------------------------------
# Forward
# ---------------------------------------------------------------------------

def latent_embedding(inputs, weight_p, bias_p, num_latents, latent_dim, *,
                     compute_dtype=None, force_pallas=False,
                     small_fallback_elems=1 << 18):
    """Pallas forward of LatentEmbedding.

    inputs   : (..., items, input_dim)
    weight_p : (input_dim, n_pad), n_pad = round_up(num_latents*latent_dim, 128),
               pre-padded once via pad_params() (padded columns are zero)
    bias_p   : (1, n_pad)
    returns  : (..., items, num_latents, latent_dim)
    """
    out_dim = num_latents * latent_dim
    in_dim = inputs.shape[-1]
    K, n_pad = weight_p.shape
    assert K == in_dim, "weight input_dim mismatch"
    assert n_pad % 128 == 0 and n_pad >= out_dim, "weight must be padded via pad_params()"
    assert bias_p.shape == (1, n_pad)

    lead = inputs.shape[:-1]
    M = 1
    for d in lead:
        M *= d
    x2d = inputs.reshape(M, in_dim)

    if compute_dtype is None and weight_p.dtype != inputs.dtype:
        compute_dtype = jnp.promote_types(weight_p.dtype, inputs.dtype)

    # Tiny problems: kernel launch + per-grid-step overhead dwarfs the matmul.
    if not force_pallas and M * in_dim * n_pad <= small_fallback_elems:
        out2d = (jnp.dot(x2d, weight_p, preferred_element_type=jnp.float32)
                 + bias_p.astype(jnp.float32)).astype(inputs.dtype)
        return out2d[:, :out_dim].reshape(*lead, num_latents, latent_dim)

    x_isz = jnp.dtype(inputs.dtype).itemsize
    w_isz = jnp.dtype(weight_p.dtype).itemsize
    out_isz = x_isz

    capacity = _vmem_capacity_bytes()
    budget = int(capacity * 0.55)  # pipeline buffers; leave compiler scratch headroom
    tm, tn, tk = _choose_tiles(M, K, n_pad, x_isz, w_isz, out_isz, budget)

    grid_m = pl.cdiv(M, tm)
    grid_n = pl.cdiv(n_pad, tn)
    grid_k = pl.cdiv(K, tk)

    # v7x has 2 TensorCores sharing the "parallel" grid: ensure >= 2 parallel blocks.
    if grid_m * grid_n == 1 and M >= 16:
        tm = _round_up((M + 1) // 2, 8)
        grid_m = pl.cdiv(M, tm)

    footprint = (2 * tm * tk * x_isz + 2 * tk * tn * w_isz + 2 * tn * w_isz
                 + 2 * tm * tn * out_isz + (tm * tn * 4 if grid_k > 1 else 0))
    vmem_limit = max(32 << 20, min(int(capacity * 0.9), footprint + (16 << 20)))

    # Honest traffic estimate: with K resident, X is read once and W is re-streamed
    # only when N is tiled; with K tiled, W is re-read per row tile and X per N tile.
    if grid_k == 1:
        x_passes, w_passes = 1, (1 if grid_n == 1 else grid_m)
    else:
        x_passes, w_passes = grid_n, grid_m
    cost = pl.CostEstimate(
        flops=2 * M * K * n_pad,
        transcendentals=0,
        bytes_accessed=(x_passes * M * K * x_isz
                        + w_passes * K * n_pad * w_isz
                        + M * n_pad * out_isz),
    )

    if grid_k == 1:
        kernel = functools.partial(_proj_kernel, compute_dtype=compute_dtype)
        grid_spec = pltpu.PrefetchScalarGridSpec(
            num_scalar_prefetch=0,
            grid=(grid_m, grid_n),
            in_specs=[
                pl.BlockSpec((tm, tk), lambda i, j: (i, 0)),   # X row tile (read once)
                pl.BlockSpec((tk, tn), lambda i, j: (0, j)),   # W tile (resident if grid_n==1)
                pl.BlockSpec((1, tn), lambda i, j: (0, j)),    # bias tile
            ],
            out_specs=pl.BlockSpec((tm, tn), lambda i, j: (i, j)),
        )
        dim_sem = ("parallel", "parallel")
    else:
        kernel = functools.partial(_proj_kernel_ktiled, compute_dtype=compute_dtype)
        grid_spec = pltpu.PrefetchScalarGridSpec(
            num_scalar_prefetch=0,
            grid=(grid_m, grid_n, grid_k),
            in_specs=[
                pl.BlockSpec((tm, tk), lambda i, j, k: (i, k)),
                pl.BlockSpec((tk, tn), lambda i, j, k: (k, j)),
                pl.BlockSpec((1, tn), lambda i, j, k: (0, j)),
            ],
            out_specs=pl.BlockSpec((tm, tn), lambda i, j, k: (i, j)),
            scratch_shapes=[pltpu.VMEM((tm, tn), jnp.float32)],
        )
        dim_sem = ("parallel", "parallel", "arbitrary")

    out2d = pl.pallas_call(
        kernel,
        out_shape=jax.ShapeDtypeStruct((M, n_pad), inputs.dtype),
        grid_spec=grid_spec,
        compiler_params=pltpu.CompilerParams(
            dimension_semantics=dim_sem,
            vmem_limit_bytes=int(vmem_limit),
        ),
        cost_estimate=cost,
    )(x2d, weight_p, bias_p)

    if n_pad != out_dim:
        # TODO(synk): for out_dim >= 128, benchmark an unpadded masked-store output vs pad+slice.
        out2d = out2d[:, :out_dim]
    return out2d.reshape(*lead, num_latents, latent_dim)


def make_params(key, input_dim, latent_dim, num_latents, dtype=jnp.float32):
    """Deterministic synthetic init matching nn.Linear(input_dim, num_latents*latent_dim)."""
    out_dim = num_latents * latent_dim
    kw, kb = jax.random.split(key)
    bound = 1.0 / (input_dim ** 0.5)
    # torch stores (out, in); we keep (in, out) for the kernel — same math as x @ W.T.
    weight = jax.random.uniform(kw, (input_dim, out_dim), dtype, minval=-bound, maxval=bound)
    bias = jax.random.uniform(kb, (out_dim,), dtype, minval=-bound, maxval=bound)
    return weight, bias


if __name__ == "__main__":
    input_dim, latent_dim, num_latents = 32, 16, 4
    batch, items = 2, 8

    key = jax.random.PRNGKey(0)
    kx, kp = jax.random.split(key)
    x = jax.random.normal(kx, (batch, items, input_dim), jnp.float32)
    weight, bias = make_params(kp, input_dim, latent_dim, num_latents)

    # Pad once, outside the jitted forward (perf-review item 1).
    w_pad, b_pad = pad_params(weight, bias)

    fwd = jax.jit(functools.partial(
        latent_embedding, num_latents=num_latents, latent_dim=latent_dim,
        force_pallas=True))

    out = jax.block_until_ready(fwd(x, w_pad, b_pad))

    # Reference (plain JAX), same semantics as the PyTorch module.
    ref = (x.reshape(-1, input_dim) @ weight + bias).reshape(
        batch, items, num_latents, latent_dim)
    assert out.shape == (batch, items, num_latents, latent_dim)
    assert jnp.allclose(out, ref, atol=1e-5, rtol=1e-5)

    # bf16 end-to-end path (feeds the MXU natively, halves X/W HBM traffic).
    w16, b16 = pad_params(weight, bias, dtype=jnp.bfloat16)
    out16 = jax.block_until_ready(fwd(x.astype(jnp.bfloat16), w16, b16))
    assert jnp.allclose(out16.astype(jnp.float32), ref, atol=6e-2, rtol=6e-2)

    print("KERNEL_OK")
</pallas_src>

<mosaic_0001>
module attributes {stable_mosaic.version = 11 : i64} {
  func.func @_proj_kernel(%arg0: i32, %arg1: i32, %arg2: memref<8x32xf32, #tpu.memory_space<vmem>>, %arg3: memref<32x128xf32, #tpu.memory_space<vmem>>, %arg4: memref<1x128xf32, #tpu.memory_space<vmem>>, %arg5: memref<8x128xf32, #tpu.memory_space<vmem>>) attributes {dimension_semantics = [#tpu.dimension_semantics<parallel>, #tpu.dimension_semantics<parallel>], iteration_bounds = array<i64: 2, 1>, scalar_prefetch = 0 : i64, scratch_operands = 0 : i64, tpu.core_type = #tpu.core_type<tc>, window_params = [{transform_indices = @transform_0, window_bounds = array<i64: 8, 32>}, {transform_indices = @transform_1, window_bounds = array<i64: 32, 128>}, {transform_indices = @transform_2, window_bounds = array<i64: 1, 128>}, {transform_indices = @transform_3, window_bounds = array<i64: 8, 128>}]} {
    %c0 = arith.constant 0 : index
    %c0_0 = arith.constant 0 : index
    %0 = vector.load %arg2[%c0, %c0_0] : memref<8x32xf32, #tpu.memory_space<vmem>>, vector<8x32xf32>
    %c0_1 = arith.constant 0 : index
    %c0_2 = arith.constant 0 : index
    %1 = vector.load %arg3[%c0_1, %c0_2] : memref<32x128xf32, #tpu.memory_space<vmem>>, vector<32x128xf32>
    %cst = arith.constant dense<0.000000e+00> : vector<8x128xf32>
    %2 = tpu.matmul %0, %1, %cst {dimension_numbers = #tpu.dot_dimension_numbers<[1], [0], [0], [1], [0, 0, 1, 1], [], []>} : vector<8x32xf32>, vector<32x128xf32>, vector<8x128xf32> -> vector<8x128xf32>
    %c0_3 = arith.constant 0 : index
    %c0_4 = arith.constant 0 : index
    %3 = vector.load %arg4[%c0_3, %c0_4] : memref<1x128xf32, #tpu.memory_space<vmem>>, vector<1x128xf32>
    %4 = vector.broadcast %3 : vector<1x128xf32> to vector<8x128xf32>
    %5 = arith.addf %2, %4 : vector<8x128xf32>
    %c0_5 = arith.constant 0 : index
    %c0_6 = arith.constant 0 : index
    %6 = vector.load %arg5[%c0_5, %c0_6] : memref<8x128xf32, #tpu.memory_space<vmem>>, vector<8x128xf32>
    tpu.vector_store %arg5[%c0_5, %c0_6], %5 {strides = array<i32>} : memref<8x128xf32, #tpu.memory_space<vmem>>, vector<8x128xf32>,
    return
  }
  func.func @transform_0(%arg0: i32, %arg1: i32) -> (i32, i32) {
    %c0_i32 = arith.constant 0 : i32
    %c0_i32_0 = arith.constant 0 : i32
    return %arg0, %c0_i32 : i32, i32
  }
  func.func @transform_1(%arg0: i32, %arg1: i32) -> (i32, i32) {
    %c0_i32 = arith.constant 0 : i32
    %c0_i32_0 = arith.constant 0 : i32
    return %c0_i32, %arg1 : i32, i32
  }
  func.func @transform_2(%arg0: i32, %arg1: i32) -> (i32, i32) {
    %c0_i32 = arith.constant 0 : i32
    %c0_i32_0 = arith.constant 0 : i32
    return %c0_i32, %arg1 : i32, i32
  }
  func.func @transform_3(%arg0: i32, %arg1: i32) -> (i32, i32) {
    %c0_i32 = arith.constant 0 : i32
    return %arg0, %arg1 : i32, i32
  }
}

</mosaic_0001>

<bundles_post_ra>
// kernel: latent_embedding.1
= control target key start
LH: loop header
LB: loop body
LE: loop exit
PB: predicated region body
PF: predicated region fallthrough
CT: control target
= control target key end

     0   :  { %8 = vsyncpa [#allocation3], 0  ;;  %s844_s0 = inlined_call_operand.hbm [shape: f32[16,32], index: 0, kind: input, shape index: {}]   ;;  %s845_s1 = inlined_call_operand.hbm [shape: f32[32,128], index: 1, kind: input, shape index: {}]   ;;  %s846_s2 = inlined_call_operand.vmem [shape: f32[1,128], index: 2, kind: input, shape index: {}]   ;;  %s847_s3 = inlined_call_operand.vmem [shape: f32[16,128], index: 3, kind: output, shape index: {}]  }
   0x1   :  { %10 = vsyncpa [#allocation3 + $0x1], 0 }
   0x2   :  { %11 = vsyncpa [#allocation5], 0  ;;  %s686_s12 = smov 0   ;;  %s688_s13 = smov 0  }
   0x3   :  { %s690_s14 = smov 0   ;;  %s692_s15 = smov 0  }
   0x4   :  { %s694_s16 = smov 0   ;;  %s696_s17 = smov 0  }
   0x5 LB: > { %s436_s18 = sadd.s32 4294967295, %s657_s17   ;;  %p49_p0 = scmp.ne.s32.totalorder %s641_s13, %s637_s12  ;;  %s657_s17 = sphi %s696_s17, %s17_s17   ;;  %s653_s16 = sphi %s694_s16, %s864_s16   ;;  %s649_s15 = sphi %s692_s15, %s863_s15   ;;  %s645_s14 = sphi %s690_s14, %s862_s14   ;;  %s641_s13 = sphi %s688_s13, %s861_s13   ;;  %s637_s12 = sphi %s686_s12, %s860_s12  }
   0x6   : > { %p716_p1 = scmp.eq.s32.totalorder %s436_s18, 0  ;;  %p438_p2 = scmp.ge.s32.totalorder %s657_s17, 1 }
   0x7   : > { %p140_p3 = scmp.lt.s32.totalorder %s657_s17, 3  ;;  %s659_s22 = smov [#allocation4]  }
   0x8   : > { %s852_s19 = scalar_select %p716_p1, 1, 0 }
   0x9   : > { %p724_p4 = por %p716_p1, %p49_p0  ;;  %p728_p5 = pnand %p438_p2, %p140_p3 }
   0xa   : > { %s154_s23 = sshll.u32 %s659_s22, 4  ;;  %s29_s25 = sadd.s32 1, %s653_s16  ;;  %s155_s23 = int_to_ptr.vmem [resolvable:$true] %s154_s23 }
   0xb   : > { %s853_s20 = scalar_select %p724_p4, 1, 0 }
   0xc   : > { %s854_s21 = scalar_select %p728_p5, 1, 0 }
   0xd   : > { %p480_p6 = pneg %p728_p5  ;;  %s545_s28 = scalar_lea.hbm %s845_s1, 512 }
   0xe   : > { %p546_p8 = scmp.ne.s32.totalorder %s845_s1, %s545_s28  ;;  %p552_p12 = scmp.lt.u32.totalorder %s545_s28, %s845_s1 }
   0xf   : > { %p736_p7 = pnand %p480_p6, %p716_p1 }
  0x11   : > { %p547_p9 = pneg %p736_p7 }
  0x13   : > { %p548_p10 = pnand %p547_p9, %p546_p8 }
  0x15   : > { %p549_p11 = pneg %p548_p10 }
  0x17   : > { %p554_p13 = pnand %p552_p12, %p549_p11 }
  0x19   : > { %557 = shalt.err (!%p554_p13)
}
  0x1a   : > { %s558_s6 = scalar_lea.vmem %s155_s23, 512  ;;  %p566_p6 = scmp.lt.s32.totalorder %s155_s23, %s155_s23 }
  0x1b   : > { %p559_p0 = scmp.ne.s32.totalorder %s155_s23, %s558_s6  ;;  %p567_p1 = scmp.lt.s32.totalorder %s558_s6, %s558_s6 }
  0x1d   : > { %p561_p2 = pnand %p559_p0, %p547_p9  ;;  %p568_p4 = por %p567_p1, %p566_p6 }
  0x1f   : > { %p562_p3 = pneg %p561_p2 }
  0x21   : > { %p569_p5 = pnand %p568_p4, %p562_p3 }
  0x23   : > { %572 = shalt.err (!%p569_p5)
}
  0x24   : > { %s660_s7 = smov 128   ;;  %s661_s8 = smov 8  }
  0x25   : > { %483 = dma.hbm_to_vmem [thread:$0]  (!%p736_p7), %s845_s1, 512, %s155_s23, [#allocation5], %s660_s7, %s660_s7, %s661_s8  }
  0x26   : > { %p31_p1 = scmp.ge.s32.totalorder %s29_s25, 2  ;;  %s36_s11 = sadd.s32 1, %s645_s14 }
  0x27   : > { %p43_p4 = scmp.ne.s32.totalorder %s645_s14, %s641_s13  ;;  %p44_p5 = scmp.eq.s32.totalorder %s657_s17, 0 }
  0x28   : > { %s866_s25 = smov (%p31_p1, %s29_s25), 0  ;;  %p489_p9 = scmp.lt.s32.totalorder %s657_s17, 2 }
  0x29   : > { %p45_p8 = por %p44_p5, %p43_p4  ;;  %s33_s12 = ssub.s32 %s653_s16, %s866_s25 }
  0x2a   : > { %s174_s18 = sand.u32 1, %s645_s14   ;;  %p34_p10 = scmp.eq.s32.totalorder %s33_s12, 0 }
  0x2b   : > { %s442_s22 = sshll.u32 %s174_s18, 3  ;;  %s443_s26 = sshll.u32 %s653_s16, 7 }
  0x2c   : > { %s769_s27 = scalar_select %p34_p10, %s645_s14, %s36_s11  }
  0x2d   : > { %s774_s23 = scalar_lea.hbm %s844_s0, %s443_s26  ;;  %s178_s29 = scalar_lea.vmem [#allocation2], %s442_s22 }
  0x2e   : > { %s185_s30 = sshll.u32 %s178_s29, 4  ;;  %p776_p7 = pnand %p489_p9, %p45_p8  ;;  %s780_s30 = int_to_ptr.vmem [resolvable:$true] %s185_s30 }
  0x2f   : > { %s175_s5 = scalar_lea.sflag [#allocation3], %s174_s18  ;;  %s573_s6 = scalar_lea.hbm %s774_s23, 128 }
  0x30   : > { %p574_p11 = scmp.ne.s32.totalorder %s774_s23, %s573_s6  ;;  %p575_p12 = pneg %p776_p7 }
  0x31   : > { %s578_s9 = scalar_lea.hbm %s844_s0, 256  ;;  %p579_p2 = scmp.lt.u32.totalorder %s774_s23, %s844_s0 }
  0x32   : > { %p576_p13 = pnand %p575_p12, %p574_p11  ;;  %p580_p3 = scmp.lt.u32.totalorder %s578_s9, %s573_s6 }
  0x33   : > { %p582_p1 = scmp.lt.u32.totalorder %s573_s6, %s774_s23 }
  0x34   : > { %p577_p0 = pneg %p576_p13  ;;  %p581_p6 = por %p580_p3, %p579_p2 }
  0x36   : > { %p583_p4 = por %p582_p1, %p581_p6 }
  0x38   : > { %p584_p5 = pnand %p583_p4, %p577_p0 }
  0x3a   : > { %587 = shalt.err (!%p584_p5)
}
  0x3b   : > { %s588_s12 = scalar_lea.vmem %s780_s30, 128  ;;  %s662_s18 = smov [#allocation2]  }
  0x3c   : > { %p589_p8 = scmp.ne.s32.totalorder %s780_s30, %s588_s12  ;;  %s593_s22 = sshll.u32 %s662_s18, 4  ;;  %s594_s22 = int_to_ptr.vmem [resolvable:$false] %s593_s22 }
  0x3d   : > { %s595_s26 = scalar_lea.vmem %s594_s22, 256  ;;  %p596_p11 = scmp.lt.s32.totalorder %s780_s30, %s594_s22 }
  0x3e   : > { %p591_p9 = pnand %p589_p8, %p575_p12  ;;  %p597_p13 = scmp.lt.s32.totalorder %s595_s26, %s588_s12 }
  0x40   : > { %p592_p10 = pneg %p591_p9  ;;  %p598_p2 = por %p597_p13, %p596_p11 }
  0x42   : > { %p599_p3 = pnand %p598_p2, %p592_p10 }
  0x44   : > { %602 = shalt.err (!%p599_p3)
}
  0x45   : > { %487 = dma.hbm_to_vmem [thread:$0]  (!%p776_p7), %s774_s23, 128, %s780_s30, %s175_s5  }
  0x46   : > { %p857_p0 = scmp.ne.s32.totalorder %s854_s21, 0 }
  0x47   : > { %s196_s24 = sand.u32 (!%p857_p0), 1, %s641_s13   ;;  %p858_p12 = scmp.ne.s32.totalorder (!%p857_p0), %s853_s20, 0 }
  0x48   : > { %194 = sbr.rel (%p857_p0) target bundleno = 309 (0x135), region = 32  ;;  %s445_s28 = sshll.u32 (!%p857_p0), %s196_s24, 3 }
  0x49   : > { %s197_s29 = scalar_lea.sflag (!%p857_p0), [#allocation3], %s196_s24  ;;  %s200_s6 = scalar_lea.vmem (!%p857_p0), [#allocation2], %s445_s28 }
  0x4f   : > { %628 = dma.done.wait (%p858_p12), %s197_s29, 128  }
  0x50   : > { %630 = vsyncadd (%p858_p12), %s197_s29, 4294967168  ;;  %p859_p6 = scmp.ne.s32.totalorder %s852_s19, 0 }
  0x52   : > { %632 = dma.done.wait (%p859_p6), [#allocation5], 512  }
  0x53   : > { %634 = vsyncadd (%p859_p6), [#allocation5], 4294966784  ;;  %v663_v0 = vmov 0.0|0.0   ;;  %vm664_vm0 = vmmov 0   ;;  %v665_v1 = vmov 0.0   ;;  %v243_v2 = vld [vmem:[#allocation4] sm:$0xff] }
  0x54   : > { %468 = vmatprep.subr.bf16.mxu0 %v663_v0  ;;  %465 = vmatprep.mubr.msk.f32.mxu0 %vm664_vm0, %v665_v1  ;;  %v244_v3 = vld [vmem:[#allocation4 + $0x8] sm:$0xff]  ;;  %v245_v4 = vld [vmem:[#allocation4 + $0x10] sm:$0xff]  ;;  %v246_v6 = vld [vmem:[#allocation4 + $0x18] sm:$0xff]  ;;  %vm254_vm1 = vcmask 261120   ;;  %p235_p7 = scmp.lt.s32.totalorder %s649_s15, 1 }
  0x55   : > { %v469_v5 = vpack.c.bf16 %v244_v3, %v243_v2  ;;  %v472_v7 = vpack.c.bf16 %v246_v6, %v245_v4  ;;  %v242_v8 = vld [vmem:[%s200_s6] sm:$0xff] }
  0x56   : > { %s868_s15 = smov (!%p235_p7, %s649_s15), 1  ;;  %v448_v9 = vld [vmem:[%s846_s2] ss:$0 sm:$0xff] }
  0x57   : > { %470 = vmatpush3.bf16.msra.mxu0 %v469_v5  ;;  %s447_s19 = sshll.u32 %s868_s15, 3 }
  0x58   : > { %471 = vmatprep.subr.bf16.mxu0 %v663_v0  ;;  %s241_s4 = scalar_lea.vmem %s847_s3, %s447_s19 }
  0x5b   : > { %473 = vmatpush3.bf16.msra.mxu0 %v472_v7 }
  0x5e   : > { %466 = vmatmul.mubr.msk.f32.vlgmr.msra.gmra.mrb[0].mxu0 %vm254_vm1, %v242_v8 }
 0x131   : > { %v324_v10 = vpop.f32.mrb[0].mxu0 }
 0x132   : > { %v325_v11 = vadd.f32 %v448_v9, %v324_v10  ;;  %v467_v12 = vpop.f32.mrb[1].mxu0 }
 0x134   : > { %328 = vst [vmem:[%s241_s4] sm:$0xff] %v325_v11 }
 0x135 PF: > { %s17_s17 = sadd.s32 1, %s657_s17   ;;  %s860_s12 = smov %s641_s13 }
 0x136   : > { %p14_p1 = scmp.ge.s32.totalorder %s17_s17, 4   ;;  %s861_s13 = smov %s645_s14 }
 0x137   : > { %s862_s14 = smov %s769_s27  ;;  %s863_s15 = smov %s653_s16 }
 0x138   : > { %s864_s16 = smov %s866_s25  ;;  %16 = sbr.rel (!%p14_p1) target bundleno = 5 (0x5), region = 80 }
 0x13f   :  { %354 = vsyncpa [#allocation3], 1 }
 0x140   :  { %356 = vsyncpa [#allocation3 + $0x1], 1 }
 0x141   :  { %357 = vsyncpa [#allocation5], 1 }

</bundles_post_ra>
